<compile_context>
chip_gen: v6e
topology: v6e:2x2x1
jax: 0.10.0
libtpu: 0.0.40
codegen_flags: <defaults>
</compile_context>

<pallas_src>
import jax
import jax.numpy as jnp
from jax.experimental import pallas as pl
from jax.experimental.pallas import tpu as pltpu


# ---------------------------------------------------------------------------
# Fused SwiGLU kernel.
#   grid = (i: M tiles, h: HIDDEN tiles)   -- h is the reduction (innermost)
#   Output is full-width (tm, Np) per row tile; acc_ref persists across h.
# ---------------------------------------------------------------------------
def _swiglu_kernel(x_ref, w12_ref, b12_ref, w3_ref, b3_ref, o_ref, acc_ref):
    h = pl.program_id(1)
    th = w3_ref.shape[0]

    @pl.when(h == 0)
    def _():
        acc_ref[...] = jnp.zeros_like(acc_ref)

    x = x_ref[...]                                                     # (tm, Kp)
    # Fused gate+value projection: ONE MXU matmul of width 2*th.
    y = jnp.dot(x, w12_ref[0], preferred_element_type=jnp.float32)     # (tm, 2*th)
    y = y + b12_ref[0]                                                 # f32 bias add
    x1 = y[:, :th]
    x2 = y[:, th:]
    hidden = (x1 * jax.nn.sigmoid(x1)) * x2                            # SiLU(x1)*x2, f32

    acc_ref[...] += jnp.dot(hidden.astype(w3_ref.dtype), w3_ref[...],
                            preferred_element_type=jnp.float32)        # (tm, Np)

    @pl.when(h == pl.num_programs(1) - 1)
    def _():
        o_ref[...] = (acc_ref[...] + b3_ref[...]).astype(o_ref.dtype)


def _round_up(x, m):
    return (x + m - 1) // m * m


def _tile_candidates(full, cap, align=128):
    """Descending multiples of `align` that divide `full` and are <= cap."""
    cands = []
    t = (min(cap, full) // align) * align
    while t >= align:
        if full % t == 0:
            cands.append(t)
        t -= align
    return cands if cands else [full]


# ---------------------------------------------------------------------------
# Wrapper: x (..., in_features) -> (..., out_features)
# Weights in "x @ W + b" layout: w1/w2 (in, hidden), w3 (hidden, out).
# ---------------------------------------------------------------------------
def swiglu(x, w1, b1, w2, b2, w3, b3, *, tm_cap=256, th_cap=512,
           vmem_budget_bytes=44 * 1024 * 1024):
    in_features, hidden_features = w1.shape
    out_features = w3.shape[1]
    assert w2.shape == (in_features, hidden_features)
    assert w3.shape == (hidden_features, out_features)
    assert x.shape[-1] == in_features

    lead = x.shape[:-1]
    M = 1
    for d in lead:
        M *= int(d)

    # Pad every problem dim to a multiple of 128 -> lane/sublane dense,
    # MXU-shaped tiles on every TPU generation (zero padding is exact).
    Kp = _round_up(in_features, 128)
    Hp = _round_up(hidden_features, 128)
    Np = _round_up(out_features, 128)
    Mp = _round_up(max(M, 1), 128)

    x2d = x.reshape(M, in_features)
    if (Mp, Kp) != (M, in_features):
        x2d = jnp.pad(x2d, ((0, Mp - M), (0, Kp - in_features)))

    # ---- tile selection against an explicit VMEM budget --------------------
    xb = jnp.dtype(x.dtype).itemsize
    wb = jnp.dtype(w1.dtype).itemsize
    ob = xb

    def vmem_estimate(tm, th):
        est = 2 * tm * Kp * xb              # x block (double buffered)
        est += 2 * Kp * 2 * th * wb         # packed W1|W2 block
        est += 2 * 2 * th * 4               # packed b1|b2 block (f32)
        est += 2 * th * Np * wb             # W3 block
        est += 2 * Np * 4                   # b3 (f32)
        est += 2 * tm * Np * ob             # output block
        est += tm * Np * 4                  # f32 accumulator scratch
        est += 4 * tm * 2 * th * 4          # f32 temporaries (y, x1, x2, hidden)
        return est

    tm_opts = _tile_candidates(Mp, tm_cap)
    # v7x has 2 TensorCores: prefer >= 2 steps on the parallel (row) axis.
    pref = [t for t in tm_opts if Mp // t >= 2]
    if pref:
        tm_opts = pref
    th_opts = _tile_candidates(Hp, th_cap)

    ti = hi = 0
    tm, th = tm_opts[0], th_opts[0]
    while vmem_estimate(tm, th) > vmem_budget_bytes:
        if hi + 1 < len(th_opts):           # shrink the hidden tile first
            hi += 1
            th = th_opts[hi]
        elif ti + 1 < len(tm_opts):         # then the row tile
            ti += 1
            tm = tm_opts[ti]
        else:
            # TODO(synk): extremely large out_features would need an OUT tile
            # axis plus a cached hidden scratch; not needed for EVA2 shapes.
            break

    nh = Hp // th
    grid = (Mp // tm, nh)

    # ---- pack / pad parameters ---------------------------------------------
    def pad2(a, rows, cols):
        if a.shape == (rows, cols):
            return a
        return jnp.pad(a, ((0, rows - a.shape[0]), (0, cols - a.shape[1])))

    w1p = pad2(w1, Kp, Hp)
    w2p = pad2(w2, Kp, Hp)
    # Per-hidden-tile packing: tile h holds [W1[:, h*th:(h+1)*th] | W2[:, same]].
    w12 = jnp.concatenate(
        [w1p.reshape(Kp, nh, th), w2p.reshape(Kp, nh, th)], axis=-1)
    w12 = jnp.transpose(w12, (1, 0, 2))                       # (nh, Kp, 2*th)

    b1p = jnp.pad(b1, (0, Hp - hidden_features)).astype(jnp.float32)
    b2p = jnp.pad(b2, (0, Hp - hidden_features)).astype(jnp.float32)
    b12 = jnp.concatenate(
        [b1p.reshape(nh, 1, th), b2p.reshape(nh, 1, th)], axis=-1)  # (nh,1,2*th)

    w3p = pad2(w3, Hp, Np)
    b3p = jnp.pad(b3, (0, Np - out_features)).astype(jnp.float32).reshape(1, Np)

    vmem_limit = int(min(56 * 1024 * 1024,
                         max(32 * 1024 * 1024, vmem_estimate(tm, th) * 5 // 4)))

    out2d = pl.pallas_call(
        _swiglu_kernel,
        out_shape=jax.ShapeDtypeStruct((Mp, Np), x.dtype),
        grid_spec=pltpu.PrefetchScalarGridSpec(
            num_scalar_prefetch=0,
            grid=grid,
            in_specs=[
                pl.BlockSpec((tm, Kp), lambda i, h: (i, 0)),             # x
                pl.BlockSpec((1, Kp, 2 * th), lambda i, h: (h, 0, 0)),   # W1|W2
                pl.BlockSpec((1, 1, 2 * th), lambda i, h: (h, 0, 0)),    # b1|b2
                pl.BlockSpec((th, Np), lambda i, h: (h, 0)),             # W3
                pl.BlockSpec((1, Np), lambda i, h: (0, 0)),              # b3
            ],
            out_specs=pl.BlockSpec((tm, Np), lambda i, h: (i, 0)),
            scratch_shapes=[pltpu.VMEM((tm, Np), jnp.float32)],
        ),
        compiler_params=pltpu.CompilerParams(
            dimension_semantics=("parallel", "arbitrary"),
            vmem_limit_bytes=vmem_limit,
        ),
    )(x2d, w12, b12, w3p, b3p)

    out2d = out2d[:M, :out_features]
    return out2d.reshape(lead + (out_features,))


# ---------------------------------------------------------------------------
# Pure-JAX reference (mirrors the PyTorch forward with subln=False, drop=0)
# ---------------------------------------------------------------------------
def _swiglu_ref(x, w1, b1, w2, b2, w3, b3):
    hp = jax.lax.Precision.HIGHEST
    x1 = jnp.dot(x, w1, precision=hp) + b1
    x2 = jnp.dot(x, w2, precision=hp) + b2
    hidden = jax.nn.silu(x1) * x2
    return jnp.dot(hidden, w3, precision=hp) + b3


if __name__ == "__main__":
    def run_case(key, B, S, in_f, hid_f, out_f):
        k = jax.random.split(key, 7)
        x = jax.random.normal(k[0], (B, S, in_f), dtype=jnp.float32)
        s_in = 1.0 / (in_f ** 0.5)
        s_h = 1.0 / (hid_f ** 0.5)
        w1 = jax.random.normal(k[1], (in_f, hid_f), jnp.float32) * s_in
        b1 = jax.random.normal(k[2], (hid_f,), jnp.float32) * 0.1
        w2 = jax.random.normal(k[3], (in_f, hid_f), jnp.float32) * s_in
        b2 = jax.random.normal(k[4], (hid_f,), jnp.float32) * 0.1
        w3 = jax.random.normal(k[5], (hid_f, out_f), jnp.float32) * s_h
        b3 = jax.random.normal(k[6], (out_f,), jnp.float32) * 0.1

        out = jax.block_until_ready(swiglu(x, w1, b1, w2, b2, w3, b3))
        ref = _swiglu_ref(x, w1, b1, w2, b2, w3, b3)
        assert out.shape == (B, S, out_f) and out.dtype == x.dtype
        err = float(jnp.max(jnp.abs(out - ref)))
        assert jnp.allclose(out, ref, atol=2e-3, rtol=2e-3), err

    root = jax.random.PRNGKey(0)
    k1, k2 = jax.random.split(root)
    # Aligned shapes (tokens = B*S, 2x MLP expansion).
    run_case(k1, B=2, S=16, in_f=128, hid_f=256, out_f=128)
    # Unaligned shapes to exercise the 128-padding of M / K / hidden / out.
    run_case(k2, B=2, S=13, in_f=96, hid_f=200, out_f=72)

    print("KERNEL_OK")
</pallas_src>

<mosaic_0001>
module attributes {stable_mosaic.version = 11 : i64} {
  func.func @_swiglu_kernel(%arg0: i32, %arg1: i32, %arg2: memref<128x128xf32, #tpu.memory_space<vmem>>, %arg3: memref<1x128x512xf32, #tpu.memory_space<vmem>>, %arg4: memref<1x1x512xf32, #tpu.memory_space<vmem>>, %arg5: memref<256x128xf32, #tpu.memory_space<vmem>>, %arg6: memref<1x128xf32, #tpu.memory_space<vmem>>, %arg7: memref<128x128xf32, #tpu.memory_space<vmem>>, %arg8: memref<128x128xf32, #tpu.memory_space<vmem>>) attributes {dimension_semantics = [#tpu.dimension_semantics<parallel>, #tpu.dimension_semantics<arbitrary>], iteration_bounds = array<i64: 1, 1>, scalar_prefetch = 0 : i64, scratch_operands = 1 : i64, tpu.core_type = #tpu.core_type<tc>, window_params = [{transform_indices = @transform_0, window_bounds = array<i64: 128, 128>}, {transform_indices = @transform_1, window_bounds = array<i64: 1, 128, 512>}, {transform_indices = @transform_2, window_bounds = array<i64: 1, 1, 512>}, {transform_indices = @transform_3, window_bounds = array<i64: 256, 128>}, {pipeline_mode = #tpu.pipeline_mode<synchronous>, transform_indices = @transform_4, window_bounds = array<i64: 1, 128>}, {transform_indices = @transform_5, window_bounds = array<i64: 128, 128>}]} {
    %c0_i32 = arith.constant 0 : i32
    %0 = arith.cmpi eq, %arg1, %c0_i32 : i32
    %1 = arith.extui %0 : i1 to i32
    %c0_i32_0 = arith.constant 0 : i32
    %2 = arith.cmpi ne, %1, %c0_i32_0 : i32
    scf.if %2 {
      %cst_18 = arith.constant 0.000000e+00 : f32
      %28 = vector.broadcast %cst_18 : f32 to vector<128x128xf32>
      %c0_19 = arith.constant 0 : index
      %c0_20 = arith.constant 0 : index
      %29 = vector.load %arg8[%c0_19, %c0_20] : memref<128x128xf32, #tpu.memory_space<vmem>>, vector<128x128xf32>
      tpu.vector_store %arg8[%c0_19, %c0_20], %28 {strides = array<i32>} : memref<128x128xf32, #tpu.memory_space<vmem>>, vector<128x128xf32>,
    } else {
    }
    %c0 = arith.constant 0 : index
    %c0_1 = arith.constant 0 : index
    %3 = vector.load %arg2[%c0, %c0_1] : memref<128x128xf32, #tpu.memory_space<vmem>>, vector<128x128xf32>
    %c0_2 = arith.constant 0 : index
    %c0_3 = arith.constant 0 : index
    %c0_4 = arith.constant 0 : index
    %4 = vector.load %arg3[%c0_2, %c0_3, %c0_4] : memref<1x128x512xf32, #tpu.memory_space<vmem>>, vector<1x128x512xf32>
    %5 = vector.shape_cast %4 : vector<1x128x512xf32> to vector<128x512xf32>
    %cst = arith.constant dense<0.000000e+00> : vector<128x512xf32>
    %6 = tpu.matmul %3, %5, %cst {dimension_numbers = #tpu.dot_dimension_numbers<[1], [0], [0], [1], [0, 0, 1, 1], [], []>} : vector<128x128xf32>, vector<128x512xf32>, vector<128x512xf32> -> vector<128x512xf32>
    %c0_5 = arith.constant 0 : index
    %c0_6 = arith.constant 0 : index
    %c0_7 = arith.constant 0 : index
    %7 = vector.load %arg4[%c0_5, %c0_6, %c0_7] : memref<1x1x512xf32, #tpu.memory_space<vmem>>, vector<1x1x512xf32>
    %8 = vector.shape_cast %7 : vector<1x1x512xf32> to vector<1x512xf32>
    %9 = vector.broadcast %8 : vector<1x512xf32> to vector<128x512xf32>
    %10 = arith.addf %6, %9 : vector<128x512xf32>
    %11 = vector.extract_strided_slice %10 {offsets = [0, 0], sizes = [128, 256], strides = [1, 1]} : vector<128x512xf32> to vector<128x256xf32>
    %12 = vector.extract_strided_slice %10 {offsets = [0, 256], sizes = [128, 256], strides = [1, 1]} : vector<128x512xf32> to vector<128x256xf32>
    %13 = arith.negf %11 : vector<128x256xf32>
    %14 = math.exp %13 : vector<128x256xf32>
    %cst_8 = arith.constant 1.000000e+00 : f32
    %15 = vector.broadcast %cst_8 : f32 to vector<128x256xf32>
    %16 = arith.addf %15, %14 : vector<128x256xf32>
    %17 = arith.divf %15, %16 : vector<128x256xf32>
    %18 = arith.mulf %11, %17 : vector<128x256xf32>
    %19 = arith.mulf %18, %12 : vector<128x256xf32>
    %c0_9 = arith.constant 0 : index
    %c0_10 = arith.constant 0 : index
    %20 = vector.load %arg8[%c0_9, %c0_10] : memref<128x128xf32, #tpu.memory_space<vmem>>, vector<128x128xf32>
    %c0_11 = arith.constant 0 : index
    %c0_12 = arith.constant 0 : index
    %21 = vector.load %arg5[%c0_11, %c0_12] : memref<256x128xf32, #tpu.memory_space<vmem>>, vector<256x128xf32>
    %cst_13 = arith.constant dense<0.000000e+00> : vector<128x128xf32>
    %22 = tpu.matmul %19, %21, %cst_13 {dimension_numbers = #tpu.dot_dimension_numbers<[1], [0], [0], [1], [0, 0, 1, 1], [], []>} : vector<128x256xf32>, vector<256x128xf32>, vector<128x128xf32> -> vector<128x128xf32>
    %23 = arith.addf %20, %22 : vector<128x128xf32>
    %c0_14 = arith.constant 0 : index
    %c0_15 = arith.constant 0 : index
    %24 = vector.load %arg8[%c0_14, %c0_15] : memref<128x128xf32, #tpu.memory_space<vmem>>, vector<128x128xf32>
    tpu.vector_store %arg8[%c0_14, %c0_15], %23 {strides = array<i32>} : memref<128x128xf32, #tpu.memory_space<vmem>>, vector<128x128xf32>,
    %c0_i32_16 = arith.constant 0 : i32
    %25 = arith.cmpi eq, %arg1, %c0_i32_16 : i32
    %26 = arith.extui %25 : i1 to i32
    %c0_i32_17 = arith.constant 0 : i32
    %27 = arith.cmpi ne, %26, %c0_i32_17 : i32
    scf.if %27 {
      %c0_18 = arith.constant 0 : index
      %c0_19 = arith.constant 0 : index
      %28 = vector.load %arg8[%c0_18, %c0_19] : memref<128x128xf32, #tpu.memory_space<vmem>>, vector<128x128xf32>
      %c0_20 = arith.constant 0 : index
      %c0_21 = arith.constant 0 : index
      %29 = vector.load %arg6[%c0_20, %c0_21] : memref<1x128xf32, #tpu.memory_space<vmem>>, vector<1x128xf32>
      %30 = vector.broadcast %29 : vector<1x128xf32> to vector<128x128xf32>
      %31 = arith.addf %28, %30 : vector<128x128xf32>
      %c0_22 = arith.constant 0 : index
      %c0_23 = arith.constant 0 : index
      %32 = vector.load %arg7[%c0_22, %c0_23] : memref<128x128xf32, #tpu.memory_space<vmem>>, vector<128x128xf32>
      tpu.vector_store %arg7[%c0_22, %c0_23], %31 {strides = array<i32>} : memref<128x128xf32, #tpu.memory_space<vmem>>, vector<128x128xf32>,
    } else {
    }
    return
  }
  func.func @transform_0(%arg0: i32, %arg1: i32) -> (i32, i32) {
    %c0_i32 = arith.constant 0 : i32
    %c0_i32_0 = arith.constant 0 : i32
    return %arg0, %c0_i32 : i32, i32
  }
  func.func @transform_1(%arg0: i32, %arg1: i32) -> (i32, i32, i32) {
    %c0_i32 = arith.constant 0 : i32
    %c0_i32_0 = arith.constant 0 : i32
    %c0_i32_1 = arith.constant 0 : i32
    return %arg1, %c0_i32, %c0_i32_0 : i32, i32, i32
  }
  func.func @transform_2(%arg0: i32, %arg1: i32) -> (i32, i32, i32) {
    %c0_i32 = arith.constant 0 : i32
    %c0_i32_0 = arith.constant 0 : i32
    %c0_i32_1 = arith.constant 0 : i32
    return %arg1, %c0_i32, %c0_i32_0 : i32, i32, i32
  }
  func.func @transform_3(%arg0: i32, %arg1: i32) -> (i32, i32) {
    %c0_i32 = arith.constant 0 : i32
    %c0_i32_0 = arith.constant 0 : i32
    return %arg1, %c0_i32 : i32, i32
  }
  func.func @transform_4(%arg0: i32, %arg1: i32) -> (i32, i32) {
    %c0_i32 = arith.constant 0 : i32
    %c0_i32_0 = arith.constant 0 : i32
    %c0_i32_1 = arith.constant 0 : i32
    return %c0_i32, %c0_i32_0 : i32, i32
  }
  func.func @transform_5(%arg0: i32, %arg1: i32) -> (i32, i32) {
    %c0_i32 = arith.constant 0 : i32
    %c0_i32_0 = arith.constant 0 : i32
    return %arg0, %c0_i32 : i32, i32
  }
}

</mosaic_0001>

<bundles_post_ra>
// kernel: tpu_custom_call.1
= control target key start
LH: loop header
LB: loop body
LE: loop exit
PB: predicated region body
PF: predicated region fallthrough
CT: control target
= control target key end

     0   :  { %10 = vsyncpa [#allocation4], 0  ;;  %s1940_s0 = inlined_call_operand.hbm [shape: f32[128,128], index: 0, kind: input, shape index: {}]   ;;  %s1941_s1 = inlined_call_operand.hbm [shape: f32[1,128,512], index: 1, kind: input, shape index: {}]   ;;  %s1942_s2 = inlined_call_operand.hbm [shape: f32[1,1,512], index: 2, kind: input, shape index: {}]   ;;  %s1943_s3 = inlined_call_operand.hbm [shape: f32[256,128], index: 3, kind: input, shape index: {}]   ;;  %s1944_s4 = inlined_call_operand.vmem [shape: f32[1,128], index: 4, kind: input, shape index: {}]   ;;  %s1945_s5 = inlined_call_operand.hbm [shape: f32[128,128], index: 5, kind: output, shape index: {}]  }
   0x1   :  { %11 = vsyncpa [#allocation7], 0 }
   0x2   :  { %12 = vsyncpa [#allocation10], 0 }
   0x3   :  { %13 = vsyncpa [#allocation5], 0  ;;  %s1467_s18 = smov [#allocation6]  }
   0x4   :  { %s31_s19 = sshll.u32 %s1467_s18, 4  ;;  %s32_s19 = int_to_ptr.vmem [resolvable:$true] %s31_s19 }
   0x5   :  { %s1367_s20 = scalar_lea.vmem %s32_s19, 8192  ;;  %p1372_p1 = scmp.lt.s32.totalorder %s32_s19, %s32_s19 }
   0x6   :  { %p1368_p0 = scmp.ne.s32.totalorder %s32_s19, %s1367_s20  ;;  %p1373_p2 = scmp.lt.s32.totalorder %s1367_s20, %s1367_s20 }
   0x8   :  { %p1374_p3 = por %p1373_p2, %p1372_p1 }
   0xa   :  { %p1375_p4 = pnand %p1374_p3, %p1368_p0 }
   0xc   :  { %1378 = shalt.err (!%p1375_p4)
}
   0xd   :  { %s1468_s21 = smov 512   ;;  %s1469_s22 = smov 32  }
   0xe   :  { %37 = dma.hbm_to_vmem [thread:$0]  %s1941_s1, 8192, %s32_s19, [#allocation7], %s1468_s21, %s1468_s21, %s1469_s22  }
   0xf   :  { %s1470_s25 = smov [#allocation3]  }
  0x10   :  { %s19_s26 = sshll.u32 %s1470_s25, 4  ;;  %s20_s26 = int_to_ptr.vmem [resolvable:$true] %s19_s26 }
  0x11   :  { %s1387_s27 = scalar_lea.vmem %s20_s26, 2048  ;;  %p1392_p6 = scmp.lt.s32.totalorder %s20_s26, %s20_s26 }
  0x12   :  { %p1388_p5 = scmp.ne.s32.totalorder %s20_s26, %s1387_s27  ;;  %p1393_p7 = scmp.lt.s32.totalorder %s1387_s27, %s1387_s27 }
  0x14   :  { %p1394_p8 = por %p1393_p7, %p1392_p6 }
  0x16   :  { %p1395_p9 = pnand %p1394_p8, %p1388_p5 }
  0x18   :  { %1398 = shalt.err (!%p1395_p9)
}
  0x19   :  { %s1471_s28 = smov 128   ;;  %s1472_s29 = smov 8  }
  0x1a   :  { %25 = dma.hbm_to_vmem [thread:$0]  %s1940_s0, 2048, %s20_s26, [#allocation4], %s1471_s28, %s1471_s28, %s1472_s29  }
  0x1b   :  { %s1473_s1 = smov [#allocation8]   ;;  %s1474_s8 = smov [#allocation9]  }
  0x1c   :  { %s44_s7 = sshll.u32 %s1473_s1, 4  ;;  %s53_s9 = sshll.u32 %s1474_s8, 4  ;;  %s45_s7 = int_to_ptr.vmem [resolvable:$true] %s44_s7  ;;  %s54_s9 = int_to_ptr.vmem [resolvable:$true] %s53_s9 }
  0x1d   :  { %s1407_s10 = scalar_lea.vmem %s45_s7, 64  ;;  %p1412_p11 = scmp.lt.s32.totalorder %s45_s7, %s45_s7 }
  0x1e   :  { %p1408_p10 = scmp.ne.s32.totalorder %s45_s7, %s1407_s10  ;;  %p1413_p12 = scmp.lt.s32.totalorder %s1407_s10, %s1407_s10 }
  0x20   :  { %p1414_p13 = por %p1413_p12, %p1412_p11 }
  0x22   :  { %p1415_p0 = pnand %p1414_p13, %p1408_p10 }
  0x24   :  { %1418 = shalt.err (!%p1415_p0)
}
  0x25   :  { %47 = dma.hbm_to_vmem [thread:$0]  %s1942_s2, 64, %s45_s7, [#allocation7]  }
  0x26   :  { %s1427_s13 = scalar_lea.vmem %s54_s9, 4096  ;;  %p1432_p2 = scmp.lt.s32.totalorder %s54_s9, %s54_s9 }
  0x27   :  { %p1428_p1 = scmp.ne.s32.totalorder %s54_s9, %s1427_s13  ;;  %p1433_p3 = scmp.lt.s32.totalorder %s1427_s13, %s1427_s13 }
  0x29   :  { %p1434_p4 = por %p1433_p3, %p1432_p2 }
  0x2b   :  { %p1435_p5 = pnand %p1434_p4, %p1428_p1 }
  0x2d   :  { %1438 = shalt.err (!%p1435_p5)
}
  0x2e   :  { %59 = dma.hbm_to_vmem [thread:$0]  %s1943_s3, 4096, %s54_s9, [#allocation10], %s1471_s28, %s1471_s28, %s1472_s29  }
  0x2f   :  { %1459 = dma.done.wait [#allocation4], 2048  }
  0x30   :  { %1460 = vsyncadd [#allocation4], 4294965248 }
  0x31   :  { %1461 = dma.done.wait [#allocation7], 8256  }
  0x32   :  { %1462 = vsyncadd [#allocation7], 4294959040 }
  0x33   :  { %1463 = dma.done.wait [#allocation10], 4096  }
  0x34   :  { %1464 = vsyncadd [#allocation10], 4294963200  ;;  %v1475_v0 = vmov 0.0   ;;  %v171_v1 = vld [vmem:[#allocation6 + $0x1e8] sm:$0xff]  ;;  %v170_v2 = vld [vmem:[#allocation6 + $0x1e0] sm:$0xff] }
  0x35   :  { %260 = vmatprep.mubr.f32.mxu0 %v1475_v0  ;;  %308 = vmatprep.mubr.f32.mxu1 %v1475_v0  ;;  %v167_v3 = vld [vmem:[#allocation6 + $0x1c8] sm:$0xff]  ;;  %v166_v4 = vld [vmem:[#allocation6 + $0x1c0] sm:$0xff]  ;;  %v173_v35 = vld [vmem:[#allocation6 + $0x1f8] sm:$0xff] }
  0x36   :  { %196 = vmatprep.subr.mxu0 %v171_v1  ;;  %1189 = vmatprep.subr.mxu1 %v171_v1  ;;  %v163_v5 = vld [vmem:[#allocation6 + $0x1a8] sm:$0xff]  ;;  %v162_v6 = vld [vmem:[#allocation6 + $0x1a0] sm:$0xff]  ;;  %v172_v36 = vld [vmem:[#allocation6 + $0x1f0] sm:$0xff] }
  0x37   :  { %197 = vmatpush1.msra.mxu0 %v170_v2  ;;  %1205 = vmatpush1.msra.mxu1 %v170_v2  ;;  %v159_v7 = vld [vmem:[#allocation6 + $0x188] sm:$0xff]  ;;  %v158_v8 = vld [vmem:[#allocation6 + $0x180] sm:$0xff]  ;;  %v169_v37 = vld [vmem:[#allocation6 + $0x1d8] sm:$0xff] }
  0x38   :  { %198 = vmatprep.subr.mxu0 %v167_v3  ;;  %1190 = vmatprep.subr.mxu1 %v167_v3  ;;  %v155_v9 = vld [vmem:[#allocation6 + $0x168] sm:$0xff]  ;;  %v154_v10 = vld [vmem:[#allocation6 + $0x160] sm:$0xff]  ;;  %v168_v38 = vld [vmem:[#allocation6 + $0x1d0] sm:$0xff] }
  0x39   :  { %199 = vmatpush1.msra.mxu0 %v166_v4  ;;  %1206 = vmatpush1.msra.mxu1 %v166_v4  ;;  %v151_v11 = vld [vmem:[#allocation6 + $0x148] sm:$0xff]  ;;  %v150_v12 = vld [vmem:[#allocation6 + $0x140] sm:$0xff]  ;;  %v165_v41 = vld [vmem:[#allocation6 + $0x1b8] sm:$0xff] }
  0x3a   :  { %200 = vmatprep.subr.mxu0 %v163_v5  ;;  %1191 = vmatprep.subr.mxu1 %v163_v5  ;;  %v147_v13 = vld [vmem:[#allocation6 + $0x128] sm:$0xff]  ;;  %v146_v14 = vld [vmem:[#allocation6 + $0x120] sm:$0xff]  ;;  %v164_v42 = vld [vmem:[#allocation6 + $0x1b0] sm:$0xff] }
  0x3b   :  { %201 = vmatpush1.msra.mxu0 %v162_v6  ;;  %1207 = vmatpush1.msra.mxu1 %v162_v6  ;;  %v143_v15 = vld [vmem:[#allocation6 + $0x108] sm:$0xff]  ;;  %v142_v16 = vld [vmem:[#allocation6 + $0x100] sm:$0xff]  ;;  %v161_v43 = vld [vmem:[#allocation6 + $0x198] sm:$0xff] }
  0x3c   :  { %202 = vmatprep.subr.mxu0 %v159_v7  ;;  %1192 = vmatprep.subr.mxu1 %v159_v7  ;;  %v139_v17 = vld [vmem:[#allocation6 + $0xe8] sm:$0xff]  ;;  %v138_v18 = vld [vmem:[#allocation6 + $0xe0] sm:$0xff]  ;;  %v160_v44 = vld [vmem:[#allocation6 + $0x190] sm:$0xff] }
  0x3d   :  { %203 = vmatpush1.msra.mxu0 %v158_v8  ;;  %1208 = vmatpush1.msra.mxu1 %v158_v8  ;;  %v135_v19 = vld [vmem:[#allocation6 + $0xc8] sm:$0xff]  ;;  %v134_v20 = vld [vmem:[#allocation6 + $0xc0] sm:$0xff]  ;;  %v1541_v45 = vld [vmem:[#allocation3 + $0x10] sm:$0xff] }
  0x3e   :  { %204 = vmatprep.subr.mxu0 %v155_v9  ;;  %1193 = vmatprep.subr.mxu1 %v155_v9  ;;  %v131_v21 = vld [vmem:[#allocation6 + $0xa8] sm:$0xff]  ;;  %v130_v22 = vld [vmem:[#allocation6 + $0xa0] sm:$0xff]  ;;  %v1544_v46 = vld [vmem:[#allocation3 + $0x50] sm:$0xff] }
  0x3f   :  { %205 = vmatpush1.msra.mxu0 %v154_v10  ;;  %1209 = vmatpush1.msra.mxu1 %v154_v10  ;;  %v127_v23 = vld [vmem:[#allocation6 + $0x88] sm:$0xff]  ;;  %v126_v24 = vld [vmem:[#allocation6 + $0x80] sm:$0xff]  ;;  %v157_v47 = vld [vmem:[#allocation6 + $0x178] sm:$0xff] }
  0x40   :  { %206 = vmatprep.subr.mxu0 %v151_v11  ;;  %1194 = vmatprep.subr.mxu1 %v151_v11  ;;  %v123_v25 = vld [vmem:[#allocation6 + $0x68] sm:$0xff]  ;;  %v122_v26 = vld [vmem:[#allocation6 + $0x60] sm:$0xff]  ;;  %v156_v48 = vld [vmem:[#allocation6 + $0x170] sm:$0xff] }
  0x41   :  { %207 = vmatpush1.msra.mxu0 %v150_v12  ;;  %1210 = vmatpush1.msra.mxu1 %v150_v12  ;;  %v119_v27 = vld [vmem:[#allocation6 + $0x48] sm:$0xff]  ;;  %v118_v28 = vld [vmem:[#allocation6 + $0x40] sm:$0xff]  ;;  %v153_v49 = vld [vmem:[#allocation6 + $0x158] sm:$0xff] }
  0x42   :  { %208 = vmatprep.subr.mxu0 %v147_v13  ;;  %1195 = vmatprep.subr.mxu1 %v147_v13  ;;  %v115_v29 = vld [vmem:[#allocation6 + $0x28] sm:$0xff]  ;;  %v114_v30 = vld [vmem:[#allocation6 + $0x20] sm:$0xff]  ;;  %v152_v50 = vld [vmem:[#allocation6 + $0x150] sm:$0xff] }
  0x43   :  { %209 = vmatpush1.msra.mxu0 %v146_v14  ;;  %1211 = vmatpush1.msra.mxu1 %v146_v14  ;;  %v111_v31 = vld [vmem:[#allocation6 + $0x8] sm:$0xff]  ;;  %v110_v32 = vld [vmem:[#allocation6] sm:$0xff]  ;;  %v1549_v51 = vld [vmem:[#allocation3 + $0x18] sm:$0xff] }
  0x44   :  { %210 = vmatprep.subr.mxu0 %v143_v15  ;;  %1196 = vmatprep.subr.mxu1 %v143_v15  ;;  %v1527_v33 = vld [vmem:[#allocation3] sm:$0xff]  ;;  %v1534_v39 = vld [vmem:[#allocation3 + $0x8] sm:$0xff]  ;;  %v1552_v52 = vld [vmem:[#allocation3 + $0x58] sm:$0xff] }
  0x45   :  { %211 = vmatpush1.msra.mxu0 %v142_v16  ;;  %1212 = vmatpush1.msra.mxu1 %v142_v16  ;;  %v1529_v34 = vld [vmem:[#allocation3 + $0x40] sm:$0xff]  ;;  %v1537_v40 = vld [vmem:[#allocation3 + $0x48] sm:$0xff]  ;;  %v149_v53 = vld [vmem:[#allocation6 + $0x138] sm:$0xff] }
  0x46   :  { %212 = vmatprep.subr.mxu0 %v139_v17  ;;  %1197 = vmatprep.subr.mxu1 %v139_v17  ;;  %v148_v54 = vld [vmem:[#allocation6 + $0x130] sm:$0xff]  ;;  %v145_v55 = vld [vmem:[#allocation6 + $0x118] sm:$0xff]  ;;  %v1557_v57 = vld [vmem:[#allocation3 + $0x20] sm:$0xff] }
  0x47   :  { %213 = vmatpush1.msra.mxu0 %v138_v18  ;;  %1213 = vmatpush1.msra.mxu1 %v138_v18  ;;  %v144_v56 = vld [vmem:[#allocation6 + $0x110] sm:$0xff]  ;;  %v1560_v58 = vld [vmem:[#allocation3 + $0x60] sm:$0xff]  ;;  %v141_v59 = vld [vmem:[#allocation6 + $0xf8] sm:$0xff] }
  0x48   :  { %214 = vmatprep.subr.mxu0 %v135_v19  ;;  %1198 = vmatprep.subr.mxu1 %v135_v19  ;;  %v140_v60 = vld [vmem:[#allocation6 + $0xf0] sm:$0xff]  ;;  %v137_v61 = vld [vmem:[#allocation6 + $0xd8] sm:$0xff]  ;;  %v99_v63 = vld [vmem:[#allocation3 + $0x28] sm:$0xff] }
  0x49   :  { %215 = vmatpush1.msra.mxu0 %v134_v20  ;;  %1214 = vmatpush1.msra.mxu1 %v134_v20  ;;  %v136_v62 = vld [vmem:[#allocation6 + $0xd0] sm:$0xff]  ;;  %v1566_v1 = vld [vmem:[#allocation3 + $0x68] sm:$0xff]  ;;  %v133_v2 = vld [vmem:[#allocation6 + $0xb8] sm:$0xff] }
  0x4a   :  { %216 = vmatprep.subr.mxu0 %v131_v21  ;;  %1199 = vmatprep.subr.mxu1 %v131_v21  ;;  %v132_v3 = vld [vmem:[#allocation6 + $0xb0] sm:$0xff]  ;;  %v129_v4 = vld [vmem:[#allocation6 + $0x98] sm:$0xff] }
  0x4b   :  { %217 = vmatpush1.msra.mxu0 %v130_v22  ;;  %1215 = vmatpush1.msra.mxu1 %v130_v22  ;;  %v128_v5 = vld [vmem:[#allocation6 + $0x90] sm:$0xff]  ;;  %v125_v8 = vld [vmem:[#allocation6 + $0x78] sm:$0xff] }
  0x4c   :  { %218 = vmatprep.subr.mxu0 %v127_v23  ;;  %1200 = vmatprep.subr.mxu1 %v127_v23  ;;  %v100_v6 = vld [vmem:[#allocation3 + $0x30] sm:$0xff]  ;;  %v121_v10 = vld [vmem:[#allocation6 + $0x58] sm:$0xff] }
  0x4d   :  { %219 = vmatpush1.msra.mxu0 %v126_v24  ;;  %1216 = vmatpush1.msra.mxu1 %v126_v24  ;;  %v1571_v7 = vld [vmem:[#allocation3 + $0x70] sm:$0xff]  ;;  %v101_v12 = vld [vmem:[#allocation3 + $0x38] sm:$0xff]  ;;  %v818_v24 = vld [vmem:[#allocation9 + $0xe0] sm:$0xff] }
  0x4e   :  { %220 = vmatprep.subr.mxu0 %v123_v25  ;;  %1201 = vmatprep.subr.mxu1 %v123_v25  ;;  %v124_v9 = vld [vmem:[#allocation6 + $0x70] sm:$0xff]  ;;  %v109_v13 = vld [vmem:[#allocation3 + $0x78] sm:$0xff]  ;;  %v802_v25 = vld [vmem:[#allocation9 + $0x60] sm:$0xff] }
  0x4f   :  { %221 = vmatpush1.msra.mxu0 %v122_v26  ;;  %1217 = vmatpush1.msra.mxu1 %v122_v26  ;;  %v120_v11 = vld [vmem:[#allocation6 + $0x50] sm:$0xff]  ;;  %v117_v14 = vld [vmem:[#allocation6 + $0x38] sm:$0xff] }
  0x50   :  { %222 = vmatprep.subr.mxu0 %v119_v27  ;;  %1202 = vmatprep.subr.mxu1 %v119_v27  ;;  %v116_v15 = vld [vmem:[#allocation6 + $0x30] sm:$0xff]  ;;  %v113_v16 = vld [vmem:[#allocation6 + $0x18] sm:$0xff] }
  0x51   :  { %223 = vmatpush1.msra.mxu0 %v118_v28  ;;  %1218 = vmatpush1.msra.mxu1 %v118_v28  ;;  %v112_v17 = vld [vmem:[#allocation6 + $0x10] sm:$0xff]  ;;  %v821_v18 = vld [vmem:[#allocation9 + $0xf8] sm:$0xff] }
  0x52   :  { %224 = vmatprep.subr.mxu0 %v115_v29  ;;  %1203 = vmatprep.subr.mxu1 %v115_v29  ;;  %v805_v19 = vld [vmem:[#allocation9 + $0x78] sm:$0xff]  ;;  %v820_v20 = vld [vmem:[#allocation9 + $0xf0] sm:$0xff]  ;;  %v819_v22 = vld [vmem:[#allocation9 + $0xe8] sm:$0xff] }
  0x53   :  { %225 = vmatpush1.msra.mxu0 %v114_v30  ;;  %1219 = vmatpush1.msra.mxu1 %v114_v30  ;;  %v804_v21 = vld [vmem:[#allocation9 + $0x70] sm:$0xff]  ;;  %v803_v23 = vld [vmem:[#allocation9 + $0x68] sm:$0xff]  ;;  %v817_v26 = vld [vmem:[#allocation9 + $0xd8] sm:$0xff] }
  0x54   :  { %226 = vmatprep.subr.mxu0 %v111_v31  ;;  %1204 = vmatprep.subr.mxu1 %v111_v31  ;;  %v801_v27 = vld [vmem:[#allocation9 + $0x58] sm:$0xff]  ;;  %v816_v28 = vld [vmem:[#allocation9 + $0xd0] sm:$0xff]  ;;  %v815_v30 = vld [vmem:[#allocation9 + $0xc8] sm:$0xff] }
  0x55   :  { %227 = vmatpush1.msra.mxu0 %v110_v32  ;;  %1220 = vmatpush1.msra.mxu1 %v110_v32  ;;  %v800_v29 = vld [vmem:[#allocation9 + $0x50] sm:$0xff]  ;;  %v799_v31 = vld [vmem:[#allocation9 + $0x48] sm:$0xff]  ;;  %v814_v32 = vld [vmem:[#allocation9 + $0xc0] sm:$0xff] }
  0x56   :  { %261 = vmatmul.mubr.f32.vlgmr.msra.gmra.mxu0 %v1527_v33  ;;  %309 = vmatmul.mubr.f32.vlgmr.msra.gmra.mxu1 %v1529_v34 }
  0x57   :  { %357 = vmatprep.subr.mxu1 %v173_v35  ;;  %266 = vmatprep.mubr.f32.mxu0 %v1475_v0  ;;  %v812_v35 = vld [vmem:[#allocation9 + $0xb0] sm:$0xff] }
  0x58   :  { %358 = vmatpush1.msra.mxu1 %v172_v36  ;;  %314 = vmatprep.mubr.f32.mxu1 %v1475_v0  ;;  %v796_v36 = vld [vmem:[#allocation9 + $0x30] sm:$0xff] }
  0x59   :  { %359 = vmatprep.subr.mxu1 %v169_v37  ;;  %1109 = vmatprep.subr.mxu0 %v821_v18  ;;  %v811_v37 = vld [vmem:[#allocation9 + $0xa8] sm:$0xff] }
  0x5a   :  { %360 = vmatpush1.msra.mxu1 %v168_v38  ;;  %267 = vmatmul.mubr.f32.gmra.mxu0 %v1534_v39  ;;  %v795_v38 = vld [vmem:[#allocation9 + $0x28] sm:$0xff] }
  0x5b   :  { %315 = vmatmul.mubr.f32.gmra.mxu1 %v1537_v40  ;;  %361 = vmatprep.subr.mxu1 %v165_v41  ;;  %v809_v41 = vld [vmem:[#allocation9 + $0x98] sm:$0xff] }
  0x5c   :  { %362 = vmatpush1.msra.mxu1 %v164_v42  ;;  %272 = vmatprep.mubr.f32.mxu0 %v1475_v0  ;;  %v793_v42 = vld [vmem:[#allocation9 + $0x18] sm:$0xff] }
  0x5d   :  { %363 = vmatprep.subr.mxu1 %v161_v43  ;;  %320 = vmatprep.mubr.f32.mxu1 %v1475_v0  ;;  %v808_v43 = vld [vmem:[#allocation9 + $0x90] sm:$0xff] }
  0x5e   :  { %364 = vmatpush1.msra.mxu1 %v160_v44  ;;  %273 = vmatmul.mubr.f32.gmra.mxu0 %v1541_v45  ;;  %v792_v44 = vld [vmem:[#allocation9 + $0x10] sm:$0xff] }
  0x5f   :  { %321 = vmatmul.mubr.f32.gmra.mxu1 %v1544_v46  ;;  %365 = vmatprep.subr.mxu1 %v157_v47  ;;  %v806_v47 = vld [vmem:[#allocation9 + $0x80] sm:$0xff] }
  0x60   :  { %366 = vmatpush1.msra.mxu1 %v156_v48  ;;  %278 = vmatprep.mubr.f32.mxu0 %v1475_v0  ;;  %v790_v48 = vld [vmem:[#allocation9] sm:$0xff] }
  0x61   :  { %367 = vmatprep.subr.mxu1 %v153_v49  ;;  %326 = vmatprep.mubr.f32.mxu1 %v1475_v0  ;;  %v176_v49 = vlaneseq }
  0x62   :  { %368 = vmatpush1.msra.mxu1 %v152_v50  ;;  %279 = vmatmul.mubr.f32.gmra.mxu0 %v1549_v51 }
  0x63   :  { %327 = vmatmul.mubr.f32.gmra.mxu1 %v1552_v52  ;;  %369 = vmatprep.subr.mxu1 %v149_v53  ;;  %v1605_v50 = vshrl.u32 %v176_v49, 7 }
  0x64   :  { %370 = vmatpush1.msra.mxu1 %v148_v54  ;;  %284 = vmatprep.mubr.f32.mxu0 %v1475_v0 }
  0x65   :  { %371 = vmatprep.subr.mxu1 %v145_v55  ;;  %332 = vmatprep.mubr.f32.mxu1 %v1475_v0  ;;  %v182_v53 = vsub.s32 1, %v1605_v50 }
  0x66   :  { %372 = vmatpush1.msra.mxu1 %v144_v56  ;;  %285 = vmatmul.mubr.f32.gmra.mxu0 %v1557_v57 }
  0x67   :  { %333 = vmatmul.mubr.f32.gmra.mxu1 %v1560_v58  ;;  %373 = vmatprep.subr.mxu1 %v141_v59 }
  0x68   :  { %374 = vmatpush1.msra.mxu1 %v140_v60  ;;  %290 = vmatprep.mubr.f32.mxu0 %v1475_v0 }
  0x69   :  { %375 = vmatprep.subr.mxu1 %v137_v61  ;;  %338 = vmatprep.mubr.f32.mxu1 %v1475_v0 }
  0x6a   :  { %376 = vmatpush1.msra.mxu1 %v136_v62  ;;  %291 = vmatmul.mubr.f32.gmra.mxu0 %v99_v63 }
  0x6b   :  { %339 = vmatmul.mubr.f32.gmra.mxu1 %v1566_v1  ;;  %377 = vmatprep.subr.mxu1 %v133_v2 }
  0x6c   :  { %378 = vmatpush1.msra.mxu1 %v132_v3  ;;  %296 = vmatprep.mubr.f32.mxu0 %v1475_v0 }
  0x6d   :  { %379 = vmatprep.subr.mxu1 %v129_v4  ;;  %344 = vmatprep.mubr.f32.mxu1 %v1475_v0 }
  0x6e   :  { %380 = vmatpush1.msra.mxu1 %v128_v5  ;;  %297 = vmatmul.mubr.f32.gmra.mxu0 %v100_v6 }
  0x6f   :  { %345 = vmatmul.mubr.f32.gmra.mxu1 %v1571_v7  ;;  %381 = vmatprep.subr.mxu1 %v125_v8 }
  0x70   :  { %382 = vmatpush1.msra.mxu1 %v124_v9  ;;  %302 = vmatprep.mubr.f32.mxu0 %v1475_v0 }
  0x71   :  { %383 = vmatprep.subr.mxu1 %v121_v10  ;;  %350 = vmatprep.mubr.f32.mxu1 %v1475_v0 }
  0x72   :  { %384 = vmatpush1.msra.mxu1 %v120_v11  ;;  %303 = vmatmul.mubr.f32.gmra.mxu0 %v101_v12 }
  0x73   :  { %351 = vmatmul.mubr.f32.gmra.mxu1 %v109_v13  ;;  %385 = vmatprep.subr.mxu1 %v117_v14 }
  0x74   :  { %386 = vmatpush1.msra.mxu1 %v116_v15  ;;  %421 = vmatprep.mubr.f32.mxu1 %v1475_v0 }
  0x75   :  { %387 = vmatprep.subr.mxu1 %v113_v16  ;;  %1110 = vmatpush3.msra.mxu0 %v805_v19 }
  0x76   :  { %388 = vmatpush1.msra.mxu1 %v112_v17  ;;  %1111 = vmatprep.subr.mxu0 %v820_v20 }
  0x77   :  { %422 = vmatmul.mubr.f32.vlgmr.msra.gmra.mxu1 %v1527_v33  ;;  %1112 = vmatpush3.msra.mxu0 %v804_v21  ;;  %v798_v33 = vld [vmem:[#allocation9 + $0x40] sm:$0xff] }
  0x78   :  { %427 = vmatprep.mubr.f32.mxu1 %v1475_v0  ;;  %1113 = vmatprep.subr.mxu0 %v819_v22 }
  0x79   :  { %1114 = vmatpush3.msra.mxu0 %v803_v23 }
  0x7a   :  { %1115 = vmatprep.subr.mxu0 %v818_v24 }
  0x7b   :  { %428 = vmatmul.mubr.f32.gmra.mxu1 %v1534_v39  ;;  %1116 = vmatpush3.msra.mxu0 %v802_v25  ;;  %v810_v39 = vld [vmem:[#allocation9 + $0xa0] sm:$0xff] }
  0x7c   :  { %433 = vmatprep.mubr.f32.mxu1 %v1475_v0  ;;  %1117 = vmatprep.subr.mxu0 %v817_v26 }
  0x7d   :  { %1118 = vmatpush3.msra.mxu0 %v801_v27 }
  0x7e   :  { %1119 = vmatprep.subr.mxu0 %v816_v28 }
  0x7f   :  { %434 = vmatmul.mubr.f32.gmra.mxu1 %v1541_v45  ;;  %1120 = vmatpush3.msra.mxu0 %v800_v29  ;;  %v807_v45 = vld [vmem:[#allocation9 + $0x88] sm:$0xff] }
  0x80   :  { %439 = vmatprep.mubr.f32.mxu1 %v1475_v0  ;;  %1121 = vmatprep.subr.mxu0 %v815_v30 }
  0x81   :  { %1122 = vmatpush3.msra.mxu0 %v799_v31 }
  0x82   :  { %1123 = vmatprep.subr.mxu0 %v814_v32 }
  0x83   :  { %440 = vmatmul.mubr.f32.gmra.mxu1 %v1549_v51  ;;  %1124 = vmatpush3.msra.mxu0 %v798_v33  ;;  %v178_v51 = vsub.s32 0, %v1605_v50 }
  0x84   :  { %445 = vmatprep.mubr.f32.mxu1 %v1475_v0 }
  0x87   :  { %446 = vmatmul.mubr.f32.gmra.mxu1 %v1557_v57 }
  0x88   :  { %451 = vmatprep.mubr.f32.mxu1 %v1475_v0 }
  0x8b   :  { %452 = vmatmul.mubr.f32.gmra.mxu1 %v99_v63 }
  0x8c   :  { %457 = vmatprep.mubr.f32.mxu1 %v1475_v0 }
  0x8f   :  { %458 = vmatmul.mubr.f32.gmra.mxu1 %v100_v6 }
  0x90   :  { %463 = vmatprep.mubr.f32.mxu1 %v1475_v0 }
  0x93   :  { %464 = vmatmul.mubr.f32.gmra.mxu1 %v101_v12 }
  0x94   :  { %469 = vmatprep.mubr.f32.mxu1 %v1475_v0 }
  0x97   :  { %470 = vmatmul.mubr.f32.gmra.mxu1 %v1529_v34  ;;  %v797_v34 = vld [vmem:[#allocation9 + $0x38] sm:$0xff] }
  0x98   :  { %475 = vmatprep.mubr.f32.mxu1 %v1475_v0 }
  0x9b   :  { %476 = vmatmul.mubr.f32.gmra.mxu1 %v1537_v40  ;;  %v794_v40 = vld [vmem:[#allocation9 + $0x20] sm:$0xff] }
  0x9c   :  { %481 = vmatprep.mubr.f32.mxu1 %v1475_v0 }
  0x9f   :  { %482 = vmatmul.mubr.f32.gmra.mxu1 %v1544_v46  ;;  %v791_v46 = vld [vmem:[#allocation9 + $0x8] sm:$0xff] }
  0xa0   :  { %487 = vmatprep.mubr.f32.mxu1 %v1475_v0 }
  0xa3   :  { %488 = vmatmul.mubr.f32.gmra.mxu1 %v1552_v52  ;;  %v1608_v52 = vld [vmem:[#allocation8] sm:$0xf] }
  0xa4   :  { %493 = vmatprep.mubr.f32.mxu1 %v1475_v0  ;;  %v1612_v54 = vrot.slane %v1608_v52, %v178_v51  ;;  %v1615_v55 = vrot.slane %v1608_v52, %v182_v53  ;;  %v186_v51 = vsub.s32 2, %v1605_v50 }
  0xa7   :  { %494 = vmatmul.mubr.f32.gmra.mxu1 %v1560_v58 }
  0xa8   :  { %499 = vmatprep.mubr.f32.mxu1 %v1475_v0 }
  0xab   :  { %500 = vmatmul.mubr.f32.gmra.mxu1 %v1566_v1 }
  0xac   :  { %505 = vmatprep.mubr.f32.mxu1 %v1475_v0 }
  0xaf   :  { %506 = vmatmul.mubr.f32.gmra.mxu1 %v1571_v7 }
  0xb0   :  { %511 = vmatprep.mubr.f32.mxu1 %v1475_v0  ;;  %v813_v0 = vld [vmem:[#allocation9 + $0xb8] sm:$0xff] }
  0xb1   :  { %1125 = vmatprep.subr.mxu0 %v813_v0 }
  0xb2   :  { %1126 = vmatpush3.msra.mxu0 %v797_v34 }
  0xb3   :  { %512 = vmatmul.mubr.f32.gmra.mxu1 %v109_v13  ;;  %1127 = vmatprep.subr.mxu0 %v812_v35 }
  0xb4   :  { %1128 = vmatpush3.msra.mxu0 %v796_v36 }
  0xb5   :  { %1129 = vmatprep.subr.mxu0 %v811_v37 }
  0xb6   :  { %1130 = vmatpush3.msra.mxu0 %v795_v38 }
  0xb7   :  { %1131 = vmatprep.subr.mxu0 %v810_v39 }
  0xb8   :  { %1132 = vmatpush3.msra.mxu0 %v794_v40 }
  0xb9   :  { %1133 = vmatprep.subr.mxu0 %v809_v41 }
  0xba   :  { %1134 = vmatpush3.msra.mxu0 %v793_v42 }
  0xbb   :  { %1135 = vmatprep.subr.mxu0 %v808_v43 }
  0xbc   :  { %1136 = vmatpush3.msra.mxu0 %v792_v44 }
  0xbd   :  { %1137 = vmatprep.subr.mxu0 %v807_v45 }
  0xbe   :  { %1138 = vmatpush3.msra.mxu0 %v791_v46 }
  0xbf   :  { %1139 = vmatprep.subr.mxu0 %v806_v47 }
  0xc0   :  { %1140 = vmatpush3.msra.mxu0 %v790_v48 }
 0x116   :  { %v262_v56 = vpop.f32.mrf.mxu0  ;;  %v310_v57 = vpop.f32.mrf.mxu1 }
 0x117   :  { %v1618_v58 = vadd.f32 %v262_v56, %v1612_v54  ;;  %v1658_v32 = vadd.f32 %v310_v57, %v1612_v54 }
 0x118   :  { %v264_v59 = vpop.f32.mrf.mxu0  ;;  %v312_v60 = vpop.f32.mrf.mxu1 }
 0x119   :  { %v1076_v61 = vmul.f32 -1.442695, %v1618_v58  ;;  %v1622_v62 = vadd.f32 %v264_v59, %v1615_v55  ;;  %v1663_v36 = vadd.f32 %v312_v60, %v1615_v55  ;;  %v1092_v40 = vmul.f32 -1.442695, %v1658_v32 }
 0x11a   :  { %v268_v63 = vpop.f32.mrf.mxu0  ;;  %v190_v60 = vsub.s32 3, %v1605_v50 }
 0x11b   :  { %1231 = vpow2.f32 %v1076_v61  ;;  %v1077_v1 = vmul.f32 -1.442695, %v1622_v62  ;;  %v1626_v2 = vadd.f32 %v268_v63, %v1612_v54  ;;  %v316_v3 = vpop.f32.mrf.mxu1  ;;  %v1093_v46 = vmul.f32 -1.442695, %v1663_v36 }
 0x11c   :  { %v270_v4 = vpop.f32.mrf.mxu0  ;;  %v1669_v41 = vadd.f32 %v316_v3, %v1612_v54 }
 0x11d   :  { %1233 = vpow2.f32 %v1077_v1  ;;  %v1078_v5 = vmul.f32 -1.442695, %v1626_v2  ;;  %v1630_v6 = vadd.f32 %v270_v4, %v1615_v55  ;;  %v318_v7 = vpop.f32.mrf.mxu1 }
 0x11e   :  { %v274_v8 = vpop.f32.mrf.mxu0  ;;  %v1675_v47 = vadd.f32 %v318_v7, %v1615_v55  ;;  %v1094_v56 = vmul.f32 -1.442695, %v1669_v41 }
 0x11f   :  { %1235 = vpow2.f32 %v1078_v5  ;;  %v1079_v9 = vmul.f32 -1.442695, %v1630_v6  ;;  %v1634_v10 = vadd.f32 %v274_v8, %v1612_v54  ;;  %v322_v11 = vpop.f32.mrf.mxu1 }
 0x120   :  { %v276_v12 = vpop.f32.mrf.mxu0  ;;  %v1682_v57 = vadd.f32 %v322_v11, %v1612_v54  ;;  %v1095_v4 = vmul.f32 -1.442695, %v1675_v47 }
 0x121   :  { %1237 = vpow2.f32 %v1079_v9  ;;  %v1080_v13 = vmul.f32 -1.442695, %v1634_v10  ;;  %v1638_v14 = vadd.f32 %v276_v12, %v1615_v55  ;;  %v324_v15 = vpop.f32.mrf.mxu1 }
 0x122   :  { %v280_v16 = vpop.f32.mrf.mxu0  ;;  %v1692_v5 = vadd.f32 %v324_v15, %v1615_v55  ;;  %v1096_v11 = vmul.f32 -1.442695, %v1682_v57 }
 0x123   :  { %1239 = vpow2.f32 %v1080_v13  ;;  %v1081_v17 = vmul.f32 -1.442695, %v1638_v14  ;;  %v1642_v18 = vadd.f32 %v280_v16, %v1612_v54  ;;  %v1644_v19 = vpop.f32.mrf.mxu1  ;;  %v1701_v13 = vrot.slane %v1608_v52, %v186_v51 }
 0x124   :  { %v282_v20 = vpop.f32.mrf.mxu0  ;;  %v1704_v16 = vrot.slane %v1608_v52, %v190_v60 }
 0x125   :  { %1241 = vpow2.f32 %v1081_v17  ;;  %v1082_v21 = vmul.f32 -1.442695, %v1642_v18  ;;  %v1648_v22 = vadd.f32 %v282_v20, %v1615_v55  ;;  %v1650_v23 = vpop.f32.mrf.mxu1 }
 0x126   :  { %v286_v24 = vpop.f32.mrf.mxu0 }
 0x127   :  { %1243 = vpow2.f32 %v1082_v21  ;;  %v1083_v25 = vmul.f32 -1.442695, %v1648_v22  ;;  %v1653_v26 = vpop.f32.mrf.mxu1  ;;  %v1686_v63 = vadd.f32 %v286_v24, %v1612_v54 }
 0x128   :  { %v1232_v27 = vpop.eup %1231  ;;  %v288_v28 = vpop.f32.mrf.mxu0 }
 0x129   :  { %v614_v29 = vadd.f32 1.0, %v1232_v27  ;;  %1245 = vpow2.f32 %v1083_v25  ;;  %v1655_v30 = vpop.f32.mrf.mxu1  ;;  %v1695_v8 = vadd.f32 %v288_v28, %v1615_v55  ;;  %v1084_v17 = vmul.f32 -1.442695, %v1686_v63 }
 0x12a   :  { %v1234_v31 = vpop.eup %1233  ;;  %v292_v33 = vpop.f32.mrf.mxu0  ;;  %v1097_v25 = vmul.f32 -1.442695, %v1692_v5  ;;  %v1713_v27 = vadd.f32 %v1650_v23, %v1615_v55 }
 0x12b   :  { %1247 = vrcp.f32 %v614_v29  ;;  %v615_v0 = vadd.f32 1.0, %v1234_v31  ;;  %v1660_v34 = vpop.f32.mrf.mxu1  ;;  %v1708_v20 = vadd.f32 %v292_v33, %v1612_v54  ;;  %v1085_v52 = vmul.f32 -1.442695, %v1695_v8 }
 0x12c   :  { %v1236_v35 = vpop.eup %1235  ;;  %v294_v42 = vpop.f32.mrf.mxu0 }
 0x12d   :  { %1249 = vrcp.f32 %v615_v0  ;;  %v616_v37 = vadd.f32 1.0, %v1236_v35  ;;  %v1665_v38 = vpop.f32.mrf.mxu1  ;;  %v1717_v28 = vadd.f32 %v294_v42, %v1615_v55 }
 0x12e   :  { %v1238_v39 = vpop.eup %1237  ;;  %v298_v59 = vpop.f32.mrf.mxu0 }
 0x12f   :  { %1251 = vrcp.f32 %v616_v37  ;;  %v617_v43 = vadd.f32 1.0, %v1238_v39  ;;  %v1671_v44 = vpop.f32.mrf.mxu1  ;;  %v1721_v0 = vadd.f32 %v298_v59, %v1612_v54  ;;  %v1086_v39 = vmul.f32 -1.442695, %v1708_v20 }
 0x130   :  { %v1240_v45 = vpop.eup %1239  ;;  %v300_v12 = vpop.f32.mrf.mxu0 }
 0x131   :  { %1253 = vrcp.f32 %v617_v43  ;;  %v618_v48 = vadd.f32 1.0, %v1240_v45  ;;  %v1677_v49 = vpop.f32.mrf.mxu1  ;;  %v1099_v45 = vmul.f32 -1.442695, %v1713_v27  ;;  %v1088_v60 = vmul.f32 -1.442695, %v1721_v0 }
 0x132   :  { %v1242_v53 = vpop.eup %1241  ;;  %1255 = vpow2.f32 %v1092_v40  ;;  %v304_v35 = vpop.f32.mrf.mxu0 }
 0x133   :  { %1257 = vrcp.f32 %v618_v48  ;;  %v619_v61 = vadd.f32 1.0, %v1242_v53  ;;  %v1688_v1 = vpop.f32.mrf.mxu1  ;;  %v1738_v48 = vadd.f32 %v300_v12, %v1615_v55 }
 0x134   :  { %v1244_v3 = vpop.eup %1243  ;;  %1259 = vpow2.f32 %v1093_v46  ;;  %v1734_v46 = vadd.f32 %v1655_v30, %v1615_v55 }
 0x135   :  { %1261 = vrcp.f32 %v619_v61  ;;  %v620_v7 = vadd.f32 1.0, %v1244_v3  ;;  %v1697_v50 = vpop.f32.mrf.mxu1  ;;  %v306_v61 = vpop.f32.mrf.mxu0 }
 0x136   :  { %v1246_v9 = vpop.eup %1245  ;;  %1263 = vpow2.f32 %v1094_v56 }
 0x137   :  { %1265 = vrcp.f32 %v620_v7  ;;  %v621_v15 = vadd.f32 1.0, %v1246_v9  ;;  %v423_v21 = vpop.f32.mrf.mxu1  ;;  %v1747_v7 = vadd.f32 %v304_v35, %v1612_v54 }
 0x138   :  { %v1248_v24 = vpop.eup %1247  ;;  %1267 = vpow2.f32 %v1095_v4  ;;  %v424_v37 = vadd.f32 %v423_v21, %v1701_v13  ;;  %v1089_v21 = vmul.f32 -1.442695, %v1738_v48 }
 0x139   :  { %1269 = vrcp.f32 %v621_v15  ;;  %v425_v29 = vpop.f32.mrf.mxu1  ;;  %v710_v33 = vmul.f32 %v1248_v24, %v1618_v58  ;;  %v1730_v58 = vadd.f32 %v1653_v26, %v1612_v54  ;;  %v1753_v15 = vadd.f32 %v1660_v34, %v1612_v54 }
 0x13a   :  { %v1250_v31 = vpop.eup %1249  ;;  %1271 = vpow2.f32 %v1096_v11  ;;  %v426_v40 = vadd.f32 %v425_v29, %v1704_v16  ;;  %v1763_v24 = vadd.f32 %v306_v61, %v1615_v55  ;;  %v1101_v34 = vmul.f32 -1.442695, %v1734_v46 }
 0x13b   :  { %v711_v23 = vmul.f32 %v1250_v31, %v1622_v62  ;;  %1273 = vpow2.f32 %v1084_v17  ;;  %v429_v42 = vpop.f32.mrf.mxu1  ;;  %v1087_v62 = vmul.f32 -1.442695, %v1717_v28  ;;  %v742_v26 = vmul.f32 %v710_v33, %v424_v37 }
 0x13c   :  { %v1252_v43 = vpop.eup %1251  ;;  %1275 = vpow2.f32 %v1097_v25  ;;  %v430_v3 = vadd.f32 %v429_v42, %v1701_v13  ;;  %v1757_v17 = vadd.f32 %v1665_v38, %v1615_v55 }
 0x13d   :  { %1277 = vpow2.f32 %v1085_v52  ;;  %v743_v51 = vmul.f32 %v711_v23, %v426_v40  ;;  %v431_v53 = vpop.f32.mrf.mxu1  ;;  %v712_v59 = vmul.f32 %v1252_v43, %v1626_v2  ;;  %v1100_v2 = vmul.f32 -1.442695, %v1730_v58 }
 0x13e   :  { %v1254_v56 = vpop.eup %1253  ;;  %1279 = vpow2.f32 %v1086_v39  ;;  %v432_v9 = vadd.f32 %v431_v53, %v1704_v16  ;;  %v1090_v23 = vmul.f32 -1.442695, %v1747_v7  ;;  %v1103_v43 = vmul.f32 -1.442695, %v1757_v17 }
 0x13f   :  { %v1743_v4 = vpop.eup %1255  ;;  %v713_v30 = vmul.f32 %v1254_v56, %v1630_v6  ;;  %v435_v11 = vpop.f32.mrf.mxu1  ;;  %886 = vmatprep.mubr.f32.mxu0 %v743_v51  ;;  %1281 = vpow2.f32 %v1099_v45  ;;  %v744_v33 = vmul.f32 %v712_v59, %v430_v3  ;;  %v1777_v45 = vadd.f32 %v1671_v44, %v1612_v54 }
 0x140   :  { %v1258_v12 = vpop.eup %1257  ;;  %887 = vmatmul.mubr.f32.vlgmr.msra.gmra.mxu0 %v742_v26  ;;  %1283 = vpow2.f32 %v1087_v62  ;;  %v436_v38 = vadd.f32 %v435_v11, %v1701_v13  ;;  %v1091_v51 = vmul.f32 -1.442695, %v1763_v24 }
 0x141   :  { %v1759_v6 = vpop.eup %1259  ;;  %v745_v25 = vmul.f32 %v713_v30, %v432_v9  ;;  %v437_v52 = vpop.f32.mrf.mxu1  ;;  %v714_v31 = vmul.f32 %v1258_v12, %v1634_v10  ;;  %1285 = vpow2.f32 %v1088_v60  ;;  %v1102_v10 = vmul.f32 -1.442695, %v1753_v15 }
 0x142   :  { %v1262_v29 = vpop.eup %1261  ;;  %v438_v39 = vadd.f32 %v437_v52, %v1704_v16  ;;  %1287 = vpow2.f32 %v1100_v2  ;;  %v1104_v11 = vmul.f32 -1.442695, %v1777_v45 }
 0x143   :  { %v1768_v35 = vpop.eup %1263  ;;  %v715_v37 = vmul.f32 %v1262_v29, %v1638_v14  ;;  %v441_v40 = vpop.f32.mrf.mxu1  ;;  %891 = vmatprep.mubr.f32.mxu0 %v745_v25  ;;  %1289 = vpow2.f32 %v1089_v21  ;;  %v1783_v14 = vadd.f32 %v1677_v49, %v1615_v55  ;;  %v746_v61 = vmul.f32 %v714_v31, %v436_v38 }
 0x144   :  { %v1266_v42 = vpop.eup %1265  ;;  %892 = vmatmul.mubr.f32.gmra.mxu0 %v744_v33  ;;  %1291 = vpow2.f32 %v1101_v34  ;;  %v442_v44 = vadd.f32 %v441_v40, %v1701_v13  ;;  %v1806_v29 = vadd.f32 %v1697_v50, %v1615_v55  ;;  %v1812_v38 = vadd.f32 %v1644_v19, %v1612_v54 }
 0x145   :  { %v1779_v62 = vpop.eup %1267  ;;  %v747_v53 = vmul.f32 %v715_v37, %v438_v39  ;;  %v443_v56 = vpop.f32.mrf.mxu1  ;;  %v716_v60 = vmul.f32 %v1266_v42, %v1642_v18  ;;  %1293 = vpow2.f32 %v1090_v23  ;;  %v1797_v18 = vadd.f32 %v1688_v1, %v1612_v54 }
 0x146   :  { %v1270_v59 = vpop.eup %1269  ;;  %v444_v30 = vadd.f32 %v443_v56, %v1704_v16  ;;  %1295 = vpow2.f32 %v1102_v10  ;;  %v1105_v52 = vmul.f32 -1.442695, %v1783_v14  ;;  %v1107_v40 = vmul.f32 -1.442695, %v1806_v29 }
 0x147   :  { %v1788_v26 = vpop.eup %1271  ;;  %v717_v3 = vmul.f32 %v1270_v59, %v1648_v22  ;;  %v1792_v49 = vpop.f32.mrf.mxu1  ;;  %896 = vmatprep.mubr.f32.mxu0 %v747_v53  ;;  %1297 = vpow2.f32 %v1091_v51  ;;  %v748_v31 = vmul.f32 %v716_v60, %v442_v44  ;;  %v1106_v37 = vmul.f32 -1.442695, %v1797_v18 }
 0x148   :  { %v1274_v9 = vpop.eup %1273  ;;  %897 = vmatmul.mubr.f32.gmra.mxu0 %v746_v61  ;;  %1299 = vpow2.f32 %v1103_v43  ;;  %v1098_v19 = vmul.f32 -1.442695, %v1812_v38  ;;  %v631_v59 = vadd.f32 1.0, %v1759_v6 }
 0x149   :  { %v1799_v12 = vpop.eup %1275  ;;  %v622_v2 = vadd.f32 1.0, %v1274_v9  ;;  %v749_v22 = vmul.f32 %v717_v3, %v444_v30  ;;  %v1801_v21 = vpop.f32.mrf.mxu1 }
 0x14a   :  { %v1278_v25 = vpop.eup %1277 }
 0x14b   :  { %1301 = vrcp.f32 %v622_v2  ;;  %v623_v1 = vadd.f32 1.0, %v1278_v25  ;;  %v1808_v34 = vpop.f32.mrf.mxu1  ;;  %901 = vmatprep.mubr.f32.mxu0 %v749_v22  ;;  %v1280_v33 = vpop.eup %1279  ;;  %v630_v25 = vadd.f32 1.0, %v1743_v4 }
 0x14c   :  { %1303 = vpow2.f32 %v1104_v11  ;;  %902 = vmatmul.mubr.f32.gmra.mxu0 %v748_v31  ;;  %v1815_v23 = vpop.eup %1281  ;;  %v624_v55 = vadd.f32 1.0, %v1280_v33 }
 0x14d   :  { %1305 = vrcp.f32 %v623_v1  ;;  %v1817_v50 = vpop.f32.mrf.mxu1  ;;  %v1284_v39 = vpop.eup %1283 }
 0x14e   :  { %1307 = vpow2.f32 %v1105_v52  ;;  %v625_v42 = vadd.f32 1.0, %v1284_v39  ;;  %v1286_v54 = vpop.eup %1285  ;;  %v633_v52 = vadd.f32 1.0, %v1779_v62  ;;  %v632_v39 = vadd.f32 1.0, %v1768_v35 }
 0x14f   :  { %1309 = vrcp.f32 %v624_v55  ;;  %v1820_v10 = vpop.f32.mrf.mxu1  ;;  %v1288_v43 = vpop.eup %1287  ;;  %v626_v51 = vadd.f32 1.0, %v1286_v54  ;;  %v448_v62 = vadd.f32 %v1792_v49, %v1701_v13  ;;  %v454_v49 = vadd.f32 %v1808_v34, %v1701_v13 }
 0x150   :  { %1311 = vpow2.f32 %v1106_v37  ;;  %v1290_v56 = vpop.eup %1289  ;;  %v638_v30 = vadd.f32 1.0, %v1288_v43  ;;  %v635_v43 = vadd.f32 1.0, %v1799_v12 }
 0x151   :  { %1313 = vrcp.f32 %v625_v42  ;;  %v1823_v53 = vpop.f32.mrf.mxu1  ;;  %v1826_v60 = vpop.eup %1291  ;;  %v627_v61 = vadd.f32 1.0, %v1290_v56  ;;  %v450_v56 = vadd.f32 %v1801_v21, %v1704_v16 }
 0x152   :  { %1315 = vpow2.f32 %v1107_v40  ;;  %v1294_v3 = vpop.eup %1293 }
 0x153   :  { %1317 = vrcp.f32 %v626_v51  ;;  %v1828_v44 = vpop.f32.mrf.mxu1  ;;  %v1296_v9 = vpop.eup %1295  ;;  %v628_v11 = vadd.f32 1.0, %v1294_v3 }
 0x154   :  { %1319 = vpow2.f32 %v1098_v19  ;;  %v1298_v22 = vpop.eup %1297  ;;  %v640_v37 = vadd.f32 1.0, %v1296_v9 }
 0x155   :  { %1321 = vrcp.f32 %v627_v61  ;;  %v1830_v2 = vpop.f32.mrf.mxu1  ;;  %v1300_v6 = vpop.eup %1299  ;;  %v629_v31 = vadd.f32 1.0, %v1298_v22 }
 0x156   :  { %1323 = vrcp.f32 %v631_v59  ;;  %v641_v54 = vadd.f32 1.0, %v1300_v6 }
 0x157   :  { %1325 = vrcp.f32 %v628_v11  ;;  %v1834_v1 = vpop.f32.mrf.mxu1 }
 0x158   :  { %v1302_v33 = vpop.eup %1301  ;;  %1327 = vrcp.f32 %v638_v30 }
 0x159   :  { %v1304_v55 = vpop.eup %1303  ;;  %1329 = vrcp.f32 %v629_v31  ;;  %v473_v40 = vpop.f32.mrf.mxu1  ;;  %v718_v4 = vmul.f32 %v1302_v33, %v1686_v63  ;;  %v634_v63 = vadd.f32 1.0, %v1788_v26  ;;  %v456_v26 = vadd.f32 %v1817_v50, %v1704_v16 }
 0x15a   :  { %v1306_v42 = vpop.eup %1305  ;;  %1331 = vrcp.f32 %v630_v25  ;;  %v642_v61 = vadd.f32 1.0, %v1304_v55  ;;  %v637_v25 = vadd.f32 1.0, %v1815_v23 }
 0x15b   :  { %v1308_v19 = vpop.eup %1307  ;;  %1333 = vrcp.f32 %v633_v52  ;;  %v719_v51 = vmul.f32 %v1306_v42, %v1695_v8  ;;  %v1844_v35 = vpop.f32.mrf.mxu1  ;;  %v750_v11 = vmul.f32 %v718_v4, %v448_v62  ;;  %v639_v4 = vadd.f32 1.0, %v1826_v60 }
 0x15c   :  { %v1310_v59 = vpop.eup %1309  ;;  %1335 = vrcp.f32 %v640_v37  ;;  %v643_v21 = vadd.f32 1.0, %v1308_v19  ;;  %v460_v37 = vadd.f32 %v1820_v10, %v1701_v13  ;;  %v462_v62 = vadd.f32 %v1823_v53, %v1704_v16 }
 0x15d   :  { %v1312_v3 = vpop.eup %1311  ;;  %1337 = vrcp.f32 %v632_v39  ;;  %v751_v30 = vmul.f32 %v719_v51, %v450_v56  ;;  %v1849_v9 = vpop.f32.mrf.mxu1  ;;  %v720_v8 = vmul.f32 %v1310_v59, %v1708_v20  ;;  %v474_v56 = vadd.f32 %v473_v40, %v1704_v16 }
 0x15e   :  { %v1314_v12 = vpop.eup %1313  ;;  %1339 = vrcp.f32 %v641_v54  ;;  %v644_v31 = vadd.f32 1.0, %v1312_v3  ;;  %v466_v53 = vadd.f32 %v1828_v44, %v1701_v13 }
 0x15f   :  { %v1316_v22 = vpop.eup %1315  ;;  %1341 = vrcp.f32 %v635_v43  ;;  %v721_v6 = vmul.f32 %v1314_v12, %v1717_v28  ;;  %906 = vmatprep.mubr.f32.mxu0 %v751_v30  ;;  %v1856_v52 = vpop.f32.mrf.mxu1  ;;  %v752_v50 = vmul.f32 %v720_v8, %v454_v49  ;;  %v468_v49 = vadd.f32 %v1830_v2, %v1704_v16 }
 0x160   :  { %v1318_v34 = vpop.eup %1317  ;;  %1343 = vrcp.f32 %v642_v61  ;;  %907 = vmatmul.mubr.f32.gmra.mxu0 %v750_v11  ;;  %v645_v39 = vadd.f32 1.0, %v1316_v22 }
 0x161   :  { %v1320_v20 = vpop.eup %1319  ;;  %1345 = vrcp.f32 %v634_v63  ;;  %v753_v33 = vmul.f32 %v721_v6, %v456_v26  ;;  %v485_v55 = vpop.f32.mrf.mxu1  ;;  %v722_v28 = vmul.f32 %v1318_v34, %v1721_v0 }
 0x162   :  { %v1322_v23 = vpop.eup %1321  ;;  %1347 = vrcp.f32 %v643_v21  ;;  %v636_v43 = vadd.f32 1.0, %v1320_v20 }
 0x163   :  { %v1324_v42 = vpop.eup %1323  ;;  %1349 = vrcp.f32 %v637_v25  ;;  %v723_v54 = vmul.f32 %v1322_v23, %v1738_v48  ;;  %911 = vmatprep.mubr.f32.mxu0 %v753_v33  ;;  %v1865_v19 = vpop.f32.mrf.mxu1  ;;  %v754_v48 = vmul.f32 %v722_v28, %v460_v37  ;;  %v486_v28 = vadd.f32 %v485_v55, %v1704_v16 }
 0x164   :  { %v1326_v10 = vpop.eup %1325  ;;  %1351 = vrcp.f32 %v644_v31  ;;  %912 = vmatmul.mubr.f32.gmra.mxu0 %v752_v50  ;;  %v727_v63 = vmul.f32 %v1324_v42, %v1663_v36  ;;  %v472_v36 = vadd.f32 %v1834_v1, %v1701_v13 }
 0x165   :  { %v1328_v0 = vpop.eup %1327  ;;  %v755_v51 = vmul.f32 %v723_v54, %v462_v62  ;;  %v491_v59 = vpop.f32.mrf.mxu1  ;;  %v724_v60 = vmul.f32 %v1326_v10, %v1747_v7  ;;  %1353 = vrcp.f32 %v645_v39 }
 0x166   :  { %v1330_v61 = vpop.eup %1329  ;;  %1355 = vrcp.f32 %v639_v4  ;;  %v734_v7 = vmul.f32 %v1328_v0, %v1730_v58  ;;  %v759_v11 = vmul.f32 %v727_v63, %v474_v56 }
 0x167   :  { %v1332_v3 = vpop.eup %1331  ;;  %v725_v30 = vmul.f32 %v1330_v61, %v1763_v24  ;;  %916 = vmatprep.mubr.f32.mxu0 %v755_v51  ;;  %v495_v40 = vpop.f32.mrf.mxu1  ;;  %1357 = vrcp.f32 %v636_v43  ;;  %v480_v24 = vadd.f32 %v1849_v9, %v1704_v16  ;;  %v756_v25 = vmul.f32 %v724_v60, %v466_v53 }
 0x168   :  { %v1334_v12 = vpop.eup %1333  ;;  %917 = vmatmul.mubr.f32.gmra.mxu0 %v754_v48  ;;  %v496_v8 = vadd.f32 %v495_v40, %v1701_v13  ;;  %v726_v58 = vmul.f32 %v1332_v3, %v1658_v32  ;;  %v492_v61 = vadd.f32 %v491_v59, %v1704_v16 }
 0x169   :  { %v1336_v21 = vpop.eup %1335  ;;  %v757_v44 = vmul.f32 %v725_v30, %v468_v49  ;;  %v497_v22 = vpop.f32.mrf.mxu1  ;;  %v729_v34 = vmul.f32 %v1334_v12, %v1675_v47  ;;  %v478_v47 = vadd.f32 %v1844_v35, %v1701_v13  ;;  %v484_v35 = vadd.f32 %v1856_v52, %v1701_v13 }
 0x16a   :  { %v1338_v2 = vpop.eup %1337  ;;  %v1881_v6 = vmul.f32 %v734_v7, %v496_v8  ;;  %v736_v33 = vmul.f32 %v1336_v21, %v1753_v15  ;;  %v758_v9 = vmul.f32 %v726_v58, %v472_v36  ;;  %v498_v8 = vadd.f32 %v497_v22, %v1704_v16 }
 0x16b   :  { %v1340_v26 = vpop.eup %1339  ;;  %921 = vmatprep.mubr.f32.mxu0 %v757_v44  ;;  %v501_v31 = vpop.f32.mrf.mxu1  ;;  %v761_v23 = vmul.f32 %v729_v34, %v480_v24  ;;  %v728_v43 = vmul.f32 %v1338_v2, %v1669_v41 }
 0x16c   :  { %v1342_v20 = vpop.eup %1341  ;;  %922 = vmatmul.mubr.f32.gmra.mxu0 %v756_v25  ;;  %v502_v1 = vadd.f32 %v501_v31, %v1701_v13  ;;  %v737_v32 = vmul.f32 %v1340_v26, %v1757_v17 }
 0x16d   :  { %v1344_v37 = vpop.eup %1343  ;;  %926 = vmatprep.mubr.f32.mxu0 %v759_v11  ;;  %v503_v39 = vpop.f32.mrf.mxu1  ;;  %v731_v54 = vmul.f32 %v1342_v20, %v1692_v5  ;;  %v760_v48 = vmul.f32 %v728_v43, %v478_v47 }
 0x16e   :  { %v1346_v50 = vpop.eup %1345  ;;  %v768_v42 = vmul.f32 %v736_v33, %v502_v1  ;;  %v504_v4 = vadd.f32 %v503_v39, %v1704_v16  ;;  %v738_v0 = vmul.f32 %v1344_v37, %v1777_v45 }
 0x16f   :  { %v1348_v15 = vpop.eup %1347  ;;  %v507_v62 = vpop.f32.mrf.mxu1  ;;  %v763_v56 = vmul.f32 %v731_v54, %v486_v28  ;;  %v730_v3 = vmul.f32 %v1346_v50, %v1682_v57  ;;  %v490_v57 = vadd.f32 %v1865_v19, %v1701_v13 }
 0x170   :  { %v1350_v10 = vpop.eup %1349  ;;  %927 = vmatmul.mubr.f32.gmra.mxu0 %v758_v9  ;;  %v769_v55 = vmul.f32 %v737_v32, %v504_v4  ;;  %v508_v51 = vadd.f32 %v507_v62, %v1701_v13  ;;  %v739_v5 = vmul.f32 %v1348_v15, %v1783_v14 }
 0x171   :  { %v1352_v17 = vpop.eup %1351  ;;  %931 = vmatprep.mubr.f32.mxu0 %v761_v23  ;;  %v509_v60 = vpop.f32.mrf.mxu1  ;;  %v733_v63 = vmul.f32 %v1350_v10, %v1713_v27  ;;  %v762_v7 = vmul.f32 %v730_v3, %v484_v35 }
 0x172   :  { %v770_v53 = vmul.f32 %v738_v0, %v508_v51  ;;  %v510_v41 = vadd.f32 %v509_v60, %v1704_v16  ;;  %v1354_v45 = vpop.eup %1353  ;;  %v740_v52 = vmul.f32 %v1352_v17, %v1797_v18 }
 0x173   :  { %v513_v30 = vpop.f32.mrf.mxu1  ;;  %v1356_v49 = vpop.eup %1355  ;;  %v765_v14 = vmul.f32 %v733_v63, %v492_v61  ;;  %v741_v44 = vmul.f32 %v1354_v45, %v1806_v29 }
 0x174   :  { %932 = vmatmul.mubr.f32.gmra.mxu0 %v760_v48  ;;  %v771_v40 = vmul.f32 %v739_v5, %v510_v41  ;;  %v514_v59 = vadd.f32 %v513_v30, %v1701_v13  ;;  %v1358_v12 = vpop.eup %1357  ;;  %v735_v18 = vmul.f32 %v1356_v49, %v1734_v46  ;;  %v1916_v46 = vld [vmem:[%s1944_s4] ss:$0 sm:$0xff]  ;;  %s1476_s4 = smov [#allocation11]  }
 0x175   :  { %936 = vmatprep.mubr.f32.mxu0 %v763_v56  ;;  %v515_v21 = vpop.f32.mrf.mxu1  ;;  %v732_v11 = vmul.f32 %v1358_v12, %v1812_v38  ;;  %s1062_s15 = sshll.u32 %s1476_s4, 4  ;;  %s1063_s15 = int_to_ptr.vmem [resolvable:$true] %s1062_s15 }
 0x176   :  { %v772_v27 = vmul.f32 %v740_v52, %v514_v59  ;;  %v516_v36 = vadd.f32 %v515_v21, %v1704_v16  ;;  %v767_v2 = vmul.f32 %v735_v18, %v498_v8  ;;  %s1439_s16 = scalar_lea.vmem %s1063_s15, 2048  ;;  %p1444_p7 = scmp.lt.s32.totalorder %s1063_s15, %s1063_s15 }
 0x177   :  { %v764_v25 = vmul.f32 %v732_v11, %v490_v57  ;;  %p1440_p6 = scmp.ne.s32.totalorder %s1063_s15, %s1439_s16  ;;  %p1445_p8 = scmp.lt.s32.totalorder %s1439_s16, %s1439_s16 }
 0x178   :  { %937 = vmatmul.mubr.f32.gmra.mxu0 %v762_v7  ;;  %v773_v24 = vmul.f32 %v741_v44, %v516_v36 }
 0x179   :  { %941 = vmatprep.mubr.f32.mxu0 %v765_v14  ;;  %p1446_p9 = por %p1445_p8, %p1444_p7 }
 0x17b   :  { %p1447_p10 = pnand %p1446_p9, %p1440_p6 }
 0x17c   :  { %942 = vmatmul.mubr.f32.gmra.mxu0 %v764_v25 }
 0x17d   :  { %946 = vmatprep.mubr.f32.mxu0 %v767_v2 }
 0x180   :  { %947 = vmatmul.mubr.f32.gmra.mxu0 %v1881_v6 }
 0x181   :  { %951 = vmatprep.mubr.f32.mxu0 %v769_v55 }
 0x184   :  { %952 = vmatmul.mubr.f32.gmra.mxu0 %v768_v42 }
 0x185   :  { %956 = vmatprep.mubr.f32.mxu0 %v771_v40 }
 0x188   :  { %957 = vmatmul.mubr.f32.gmra.mxu0 %v770_v53 }
 0x189   :  { %961 = vmatprep.mubr.f32.mxu0 %v773_v24 }
 0x18c   :  { %962 = vmatmul.mubr.f32.gmra.mxu0 %v772_v27 }
 0x200   :  { %v1141_v13 = vpop.f32.mrf.mxu0 }
 0x202   :  { %v1142_v16 = vpop.f32.mrf.mxu0 }
 0x203   :  { %v1143_v29 = vadd.f32 %v1142_v16, %v1141_v13 }
 0x204   :  { %v1144_v38 = vpop.f32.mrf.mxu0 }
 0x205   :  { %v1025_v19 = vadd.f32 %v1143_v29, %v1916_v46 }
 0x206   :  { %v1145_v22 = vpop.f32.mrf.mxu0 }
 0x207   :  { %1041 = vst [vmem:[#allocation11] sm:$0xff] %v1025_v19  ;;  %v1146_v6 = vadd.f32 %v1145_v22, %v1144_v38 }
 0x208   :  { %v1147_v26 = vpop.f32.mrf.mxu0 }
 0x209   :  { %v1026_v58 = vadd.f32 %v1146_v6, %v1916_v46 }
 0x20a   :  { %v1148_v34 = vpop.f32.mrf.mxu0 }
 0x20b   :  { %1042 = vst [vmem:[#allocation11 + $0x8] sm:$0xff] %v1026_v58  ;;  %v1149_v31 = vadd.f32 %v1148_v34, %v1147_v26 }
 0x20c   :  { %v1150_v20 = vpop.f32.mrf.mxu0 }
 0x20d   :  { %v1027_v33 = vadd.f32 %v1149_v31, %v1916_v46 }
 0x20e   :  { %v1151_v1 = vpop.f32.mrf.mxu0 }
 0x20f   :  { %1043 = vst [vmem:[#allocation11 + $0x10] sm:$0xff] %v1027_v33  ;;  %v1152_v37 = vadd.f32 %v1151_v1, %v1150_v20 }
 0x211   :  { %v1028_v9 = vadd.f32 %v1152_v37, %v1916_v46 }
 0x213   :  { %1044 = vst [vmem:[#allocation11 + $0x18] sm:$0xff] %v1028_v9 }
 0x220   :  { %v1153_v23 = vpop.f32.mrf.mxu0 }
 0x222   :  { %v1154_v28 = vpop.f32.mrf.mxu0 }
 0x223   :  { %v1155_v39 = vadd.f32 %v1154_v28, %v1153_v23 }
 0x224   :  { %v1156_v50 = vpop.f32.mrf.mxu0 }
 0x225   :  { %v1029_v32 = vadd.f32 %v1155_v39, %v1916_v46 }
 0x226   :  { %v1157_v47 = vpop.f32.mrf.mxu0 }
 0x227   :  { %1045 = vst [vmem:[#allocation11 + $0x20] sm:$0xff] %v1029_v32  ;;  %v1158_v42 = vadd.f32 %v1157_v47, %v1156_v50 }
 0x228   :  { %v1159_v4 = vpop.f32.mrf.mxu0 }
 0x229   :  { %v1030_v15 = vadd.f32 %v1158_v42, %v1916_v46 }
 0x22a   :  { %v1160_v54 = vpop.f32.mrf.mxu0 }
 0x22b   :  { %1046 = vst [vmem:[#allocation11 + $0x28] sm:$0xff] %v1030_v15  ;;  %v1161_v62 = vadd.f32 %v1160_v54, %v1159_v4 }
 0x22c   :  { %v1162_v10 = vpop.f32.mrf.mxu0 }
 0x22d   :  { %v1031_v43 = vadd.f32 %v1161_v62, %v1916_v46 }
 0x22e   :  { %v1163_v0 = vpop.f32.mrf.mxu0 }
 0x22f   :  { %1047 = vst [vmem:[#allocation11 + $0x30] sm:$0xff] %v1031_v43  ;;  %v1164_v55 = vadd.f32 %v1163_v0, %v1162_v10 }
 0x230   :  { %v1165_v51 = vpop.f32.mrf.mxu0 }
 0x231   :  { %v1032_v17 = vadd.f32 %v1164_v55, %v1916_v46 }
 0x232   :  { %v1166_v35 = vpop.f32.mrf.mxu0 }
 0x233   :  { %1048 = vst [vmem:[#allocation11 + $0x38] sm:$0xff] %v1032_v17  ;;  %v1167_v56 = vadd.f32 %v1166_v35, %v1165_v51 }
 0x234   :  { %v1168_v61 = vpop.f32.mrf.mxu0 }
 0x235   :  { %v1033_v60 = vadd.f32 %v1167_v56, %v1916_v46 }
 0x236   :  { %v1169_v5 = vpop.f32.mrf.mxu0 }
 0x237   :  { %1049 = vst [vmem:[#allocation11 + $0x40] sm:$0xff] %v1033_v60  ;;  %v1170_v48 = vadd.f32 %v1169_v5, %v1168_v61 }
 0x238   :  { %v1171_v53 = vpop.f32.mrf.mxu0 }
 0x239   :  { %v1034_v41 = vadd.f32 %v1170_v48, %v1916_v46 }
 0x23a   :  { %v1172_v45 = vpop.f32.mrf.mxu0 }
 0x23b   :  { %1050 = vst [vmem:[#allocation11 + $0x48] sm:$0xff] %v1034_v41  ;;  %v1173_v3 = vadd.f32 %v1172_v45, %v1171_v53 }
 0x23c   :  { %v1174_v63 = vpop.f32.mrf.mxu0 }
 0x23d   :  { %v1035_v30 = vadd.f32 %v1173_v3, %v1916_v46 }
 0x23e   :  { %v1175_v49 = vpop.f32.mrf.mxu0 }
 0x23f   :  { %1051 = vst [vmem:[#allocation11 + $0x50] sm:$0xff] %v1035_v30  ;;  %v1176_v52 = vadd.f32 %v1175_v49, %v1174_v63 }
 0x240   :  { %v1177_v40 = vpop.f32.mrf.mxu0 }
 0x241   :  { %v1036_v59 = vadd.f32 %v1176_v52, %v1916_v46 }
 0x242   :  { %v1178_v12 = vpop.f32.mrf.mxu0 }
 0x243   :  { %1052 = vst [vmem:[#allocation11 + $0x58] sm:$0xff] %v1036_v59  ;;  %v1179_v7 = vadd.f32 %v1178_v12, %v1177_v40 }
 0x244   :  { %v1180_v14 = vpop.f32.mrf.mxu0 }
 0x245   :  { %v1037_v8 = vadd.f32 %v1179_v7, %v1916_v46 }
 0x246   :  { %v1181_v21 = vpop.f32.mrf.mxu0 }
 0x247   :  { %1053 = vst [vmem:[#allocation11 + $0x60] sm:$0xff] %v1037_v8  ;;  %v1182_v44 = vadd.f32 %v1181_v21, %v1180_v14 }
 0x248   :  { %v1183_v57 = vpop.f32.mrf.mxu0 }
 0x249   :  { %v1038_v27 = vadd.f32 %v1182_v44, %v1916_v46 }
 0x24a   :  { %v1184_v36 = vpop.f32.mrf.mxu0 }
 0x24b   :  { %1054 = vst [vmem:[#allocation11 + $0x68] sm:$0xff] %v1038_v27  ;;  %v1185_v18 = vadd.f32 %v1184_v36, %v1183_v57 }
 0x24c   :  { %v1186_v11 = vpop.f32.mrf.mxu0 }
 0x24d   :  { %v1039_v24 = vadd.f32 %v1185_v18, %v1916_v46 }
 0x24e   :  { %v1187_v2 = vpop.f32.mrf.mxu0 }
 0x24f   :  { %1055 = vst [vmem:[#allocation11 + $0x70] sm:$0xff] %v1039_v24  ;;  %v1188_v25 = vadd.f32 %v1187_v2, %v1186_v11 }
 0x251   :  { %v1040_v13 = vadd.f32 %v1188_v25, %v1916_v46 }
 0x253   :  { %1056 = vst [vmem:[#allocation11 + $0x78] sm:$0xff] %v1040_v13 }
 0x254   :  { %1450 = shalt.err (!%p1447_p10)
}
 0x255   :  { %1068 = dma.vmem_to_hbm [thread:$0]  %s1063_s15, 2048, %s1945_s5, [#allocation5], %s1471_s28, %s1471_s28, %s1472_s29  }
 0x256   :  { %1465 = dma.done.wait [#allocation5], 2048  }
 0x257   :  { %1466 = vsyncadd [#allocation5], 4294965248 }
 0x258   :  { %1072 = vsyncpa [#allocation4], 1 }
 0x259   :  { %1073 = vsyncpa [#allocation7], 1 }
 0x25a   :  { %1074 = vsyncpa [#allocation10], 1 }
 0x25b   :  { %1075 = vsyncpa [#allocation5], 1 }

</bundles_post_ra>
